<compile_context>
chip_gen: v6e
topology: v6e:2x2x1
jax: 0.10.0
libtpu: 0.0.40
codegen_flags: <defaults>
</compile_context>

<pallas_src>
import functools

import numpy as np
import jax
import jax.numpy as jnp
from jax.experimental import pallas as pl
from jax.experimental.pallas import tpu as pltpu


NUM_CLASS = 25
CLS_NUM_LIST = [2889, 1139, 2961, 2376, 1835, 1123, 3753, 3210, 3140, 1521,
                11243, 6651, 10870, 11123, 7455, 6711, 9194, 9059, 5715, 5225,
                294549, 2, 17, 2, 1]


def cal_effective_weight(cls_num_list, beta=0.9999):
    cls_num_list = np.array(cls_num_list, dtype=np.float64)
    effective_num = 1.0 - np.power(beta, cls_num_list)
    per_cls_weights = (1.0 - beta) / effective_num
    per_cls_weights = per_cls_weights / np.sum(per_cls_weights) * len(cls_num_list)
    return jnp.asarray(per_cls_weights, dtype=jnp.float32)


def _round_up(a, b):
    return ((a + b - 1) // b) * b


def _default_num_cores():
    # v7x has 2 TensorCores per chip; v5e/v6e have 1.  The 2-way "parallel"
    # grid axis only buys anything on v7x.
    try:
        kind = jax.devices()[0].device_kind.lower()
    except Exception:
        return 1
    return 2 if "v7" in kind else 1


def _courage_kernel(x_ref, t_ref, *refs, gamma, ignore_index, cl_eps, is_train,
                    n_tokens, tile_n, tiles_per_core):
    """One (C, tile_n) tile: classes on sublanes, tokens on lanes.

    Fuses log_softmax over the class (sublane) axis, the one-hot gather at the
    target class, and the courage bonus evaluated ONLY at the gathered target
    column; accumulates lane-dense (1, tile_n) per-token contributions into
    output blocks that stay resident across the token-tile reduction axis.
    """
    if is_train:
        w_ref, mle_ref, cl_ref = refs
    else:
        (mle_ref,) = refs
        w_ref = cl_ref = None

    i = pl.program_id(0)   # core axis ("parallel", v7x)
    j = pl.program_id(1)   # token-tile reduction axis ("arbitrary")

    @pl.when(j == 0)
    def _():
        mle_ref[...] = jnp.zeros_like(mle_ref)
        if is_train:
            cl_ref[...] = jnp.zeros_like(cl_ref)

    x = x_ref[...].astype(jnp.float32)          # (C, TN) logits (native dtype in HBM)
    t = t_ref[...]                              # (1, TN) int32 targets

    # Global token index of each lane, from the *unclamped* tile index, so the
    # ragged tail of the last real tile and any fully-out-of-range (clamped)
    # tiles are masked.  jnp.where (not `* mask`) keeps undefined tail data
    # (inf/NaN) out of the accumulators.
    tile = i * tiles_per_core + j
    col = tile * tile_n + jax.lax.broadcasted_iota(jnp.int32, (1, tile_n), 1)
    valid = jnp.logical_and(col < n_tokens, t != ignore_index)       # (1, TN)

    # log_softmax over the class (sublane) axis — the only full-width exp.
    m = jnp.max(x, axis=0, keepdims=True)                            # (1, TN)
    z = x - m
    lse = jnp.log(jnp.sum(jnp.exp(z), axis=0, keepdims=True))        # (1, TN)

    cls_id = jax.lax.broadcasted_iota(jnp.int32, x.shape, 0)         # (C, TN)
    onehot = (cls_id == t).astype(jnp.float32)                       # (C, TN)

    z_t = jnp.sum(z * onehot, axis=0, keepdims=True)                 # (1, TN)
    lp_t = z_t - lse                                                 # log p[i, t_i]

    mle_ref[...] += jnp.where(valid, -lp_t, 0.0)

    if is_train:
        w = w_ref[...].astype(jnp.float32)                           # (C, 1)
        w_t = jnp.sum(w * onehot, axis=0, keepdims=True)             # (1, TN)
        # Courage bonus only on the gathered target column (lane-dense row).
        p_t = jnp.exp(lp_t)
        g = float(gamma)
        if g > 0:
            gi = int(round(g))
            if g == float(gi) and 1 <= gi <= 8:
                # integer gamma: plain VPU multiplies, no exp/log pair on EUP
                b = p_t
                for _ in range(gi - 1):
                    b = b * p_t
                bonus_t = -b
            else:
                bonus_t = -jnp.power(p_t, jnp.float32(g))
        else:
            bonus_t = jnp.log(jnp.maximum(1.0 - p_t, jnp.float32(cl_eps)))
        cl_ref[...] += jnp.where(valid, bonus_t * w_t, 0.0)


def courage_loss(x, target, weight, *, gamma, ignore_index=-100, cl_eps=1e-5,
                 is_train=True, classes_last=True, max_tile_n=2048,
                 num_cores=None):
    """CourageLoss forward.

    x: (N, C) logits if classes_last (PyTorch layout) else (C, N).  For peak
       performance hand over (C, N) directly (classes_last=False), e.g. by
       folding the transpose into the producing matmul, to avoid one extra
       HBM pass over the logits.
    target: (N,) integer class ids (ignore_index marks ignored tokens).
    weight: (C,) per-class courage weights (only read when is_train).
    """
    if classes_last:
        x = x.T                                  # (C, N)
    C, N = x.shape
    if num_cores is None:
        num_cores = _default_num_cores()

    # Token tile: lane-dense, multiple of 128, never larger than N (so every
    # block start is in-bounds; only the last block has a ragged tail).
    if N < 128:
        tile_n = N
    else:
        tile_n = min(max_tile_n, (N // 128) * 128)

    tiles_real = pl.cdiv(N, tile_n)
    num_cores = max(1, min(num_cores, tiles_real))
    tiles_total = _round_up(tiles_real, num_cores)
    tiles_per_core = tiles_total // num_cores
    last_tile = tiles_real - 1

    t2 = target.astype(jnp.int32).reshape(1, N)

    def data_map(i, j):
        # Clamp so any fully-out-of-range tile of the last core re-reads the
        # last real tile instead of DMA-ing past the array; such tiles are
        # fully masked in-kernel via the unclamped global column index.
        return (0, jnp.minimum(i * tiles_per_core + j, last_tile))

    in_specs = [
        pl.BlockSpec((C, tile_n), data_map),     # logits, native dtype
        pl.BlockSpec((1, tile_n), data_map),     # targets, lane-dense
    ]
    inputs = [x, t2]
    if is_train:
        in_specs.append(pl.BlockSpec((C, 1), lambda i, j: (0, 0)))
        inputs.append(weight.astype(jnp.float32).reshape(C, 1))

    part = jax.ShapeDtypeStruct((num_cores, 1, tile_n), jnp.float32)
    part_spec = pl.BlockSpec((None, 1, tile_n), lambda i, j: (i, 0, 0))
    out_shape = [part, part] if is_train else [part]
    out_specs = [part_spec, part_spec] if is_train else [part_spec]

    kernel = functools.partial(
        _courage_kernel, gamma=gamma, ignore_index=ignore_index, cl_eps=cl_eps,
        is_train=is_train, n_tokens=N, tile_n=tile_n,
        tiles_per_core=tiles_per_core)

    outs = pl.pallas_call(
        kernel,
        out_shape=out_shape,
        grid_spec=pltpu.PrefetchScalarGridSpec(
            num_scalar_prefetch=0,
            grid=(num_cores, tiles_per_core),
            in_specs=in_specs,
            out_specs=out_specs,
        ),
        compiler_params=pltpu.CompilerParams(
            # axis 0 shards across TensorCores on v7x; axis 1 is the reduction.
            dimension_semantics=("parallel", "arbitrary"),
            # lane-dense tiles keep live VMEM ~3 MiB even at tile_n=2048;
            # well inside v7x's 64 MiB and leaves scoped-VMEM headroom.
            vmem_limit_bytes=16 * 1024 * 1024,
        ),
    )(*inputs)

    # Tiny XLA epilogue: valid-token count from the targets (doesn't need the
    # kernel) and the collapse of the lane-dense per-core partials.
    cnt = jnp.sum((target != ignore_index).astype(jnp.float32))
    mle_loss = jnp.sum(outs[0]) / cnt
    if is_train:
        c_loss = jnp.sum(outs[1]) / cnt
        return mle_loss + c_loss
    return mle_loss


def courage_loss_ref(x, target, weight, *, gamma, ignore_index=-100,
                     cl_eps=1e-5, is_train=True):
    """Pure-JAX reference mirroring the PyTorch forward (x is (N, C))."""
    x = x.astype(jnp.float32)
    lprobs = jax.nn.log_softmax(x, axis=1)
    valid = target != ignore_index
    t_safe = jnp.where(valid, target, 0)
    cnt = jnp.sum(valid.astype(jnp.float32))
    lp_t = jnp.take_along_axis(lprobs, t_safe[:, None], axis=1)[:, 0]
    mle = jnp.sum(jnp.where(valid, -lp_t, 0.0)) / cnt
    if not is_train:
        return mle
    probs = jnp.exp(lprobs)
    if gamma > 0:
        bonus = -jnp.power(probs, gamma)
    else:
        bonus = jnp.log(jnp.maximum(1.0 - probs, cl_eps))
    inp = -bonus * weight[None, :]
    c_t = jnp.take_along_axis(inp, t_safe[:, None], axis=1)[:, 0]
    c = jnp.sum(jnp.where(valid, -c_t, 0.0)) / cnt
    return mle + c


if __name__ == "__main__":
    IGNORE_INDEX = -100

    key = jax.random.PRNGKey(0)
    kx, kt, km = jax.random.split(key, 3)
    # token classification: e.g. batch=2 sequences of 150 tokens, 25 classes
    N, C = 300, NUM_CLASS
    x = jax.random.normal(kx, (N, C), dtype=jnp.float32) * 2.0
    target = jax.random.randint(kt, (N,), 0, C, dtype=jnp.int32)
    ignore_mask = jax.random.uniform(km, (N,)) < 0.1
    target = jnp.where(ignore_mask, IGNORE_INDEX, target)
    weight = cal_effective_weight(CLS_NUM_LIST)

    def check(out, ref, name):
        out = np.asarray(jax.block_until_ready(out))
        ref = np.asarray(ref)
        assert np.allclose(out, ref, rtol=1e-4, atol=1e-5), (name, out, ref)

    # train, integer gamma (focal-style bonus; ragged tail masking exercised)
    check(courage_loss(x, target, weight, gamma=2.0, ignore_index=IGNORE_INDEX,
                       is_train=True),
          courage_loss_ref(x, target, weight, gamma=2.0,
                           ignore_index=IGNORE_INDEX, is_train=True),
          "train_gamma2")

    # eval: no courage term, no weight input, single output
    check(courage_loss(x, target, weight, gamma=2.0, ignore_index=IGNORE_INDEX,
                       is_train=False),
          courage_loss_ref(x, target, weight, gamma=2.0,
                           ignore_index=IGNORE_INDEX, is_train=False),
          "eval")

    # train, gamma == 0 (log(1 - p) bonus branch)
    check(courage_loss(x, target, weight, gamma=0.0, ignore_index=IGNORE_INDEX,
                       is_train=True),
          courage_loss_ref(x, target, weight, gamma=0.0,
                           ignore_index=IGNORE_INDEX, is_train=True),
          "train_gamma0")

    # exercise the 2-way "parallel" core axis (v7x path; serial elsewhere)
    check(courage_loss(x, target, weight, gamma=2.0, ignore_index=IGNORE_INDEX,
                       is_train=True, num_cores=2),
          courage_loss_ref(x, target, weight, gamma=2.0,
                           ignore_index=IGNORE_INDEX, is_train=True),
          "train_2core")

    # exercise the clamped fully-out-of-range tile path (odd tile count / 2 cores)
    check(courage_loss(x, target, weight, gamma=2.0, ignore_index=IGNORE_INDEX,
                       is_train=True, num_cores=2, max_tile_n=128),
          courage_loss_ref(x, target, weight, gamma=2.0,
                           ignore_index=IGNORE_INDEX, is_train=True),
          "train_2core_clamped")

    print("KERNEL_OK")
</pallas_src>

<mosaic_0001>
module attributes {stable_mosaic.version = 11 : i64} {
  func.func @_courage_kernel(%arg0: i32, %arg1: i32, %arg2: memref<25x256xf32, #tpu.memory_space<vmem>>, %arg3: memref<1x256xi32, #tpu.memory_space<vmem>>, %arg4: memref<25x1xf32, #tpu.memory_space<vmem>>, %arg5: memref<1x1x256xf32, #tpu.memory_space<vmem>>, %arg6: memref<1x1x256xf32, #tpu.memory_space<vmem>>) attributes {dimension_semantics = [#tpu.dimension_semantics<parallel>, #tpu.dimension_semantics<arbitrary>], iteration_bounds = array<i64: 1, 2>, scalar_prefetch = 0 : i64, scratch_operands = 0 : i64, tpu.core_type = #tpu.core_type<tc>, window_params = [{transform_indices = @transform_0, window_bounds = array<i64: 25, 256>}, {transform_indices = @transform_1, window_bounds = array<i64: 1, 256>}, {pipeline_mode = #tpu.pipeline_mode<synchronous>, transform_indices = @transform_2, window_bounds = array<i64: 25, 1>}, {transform_indices = @transform_3, window_bounds = array<i64: 1, 1, 256>}, {transform_indices = @transform_4, window_bounds = array<i64: 1, 1, 256>}]} {
    %c0_i32 = arith.constant 0 : i32
    %0 = arith.cmpi eq, %arg1, %c0_i32 : i32
    %1 = arith.extui %0 : i1 to i32
    %c0_i32_0 = arith.constant 0 : i32
    %2 = arith.cmpi ne, %1, %c0_i32_0 : i32
    scf.if %2 {
      %cst_25 = arith.constant 0.000000e+00 : f32
      %61 = vector.broadcast %cst_25 : f32 to vector<1x256xf32>
      %c0_26 = arith.constant 0 : index
      %c0_27 = arith.constant 0 : index
      %c0_28 = arith.constant 0 : index
      %62 = vector.load %arg5[%c0_26, %c0_27, %c0_28] : memref<1x1x256xf32, #tpu.memory_space<vmem>>, vector<1x1x256xf32>
      %63 = vector.shape_cast %62 : vector<1x1x256xf32> to vector<1x256xf32>
      %64 = vector.shape_cast %61 : vector<1x256xf32> to vector<1x1x256xf32>
      tpu.vector_store %arg5[%c0_26, %c0_27, %c0_28], %64 {strides = array<i32>} : memref<1x1x256xf32, #tpu.memory_space<vmem>>, vector<1x1x256xf32>,
      %cst_29 = arith.constant 0.000000e+00 : f32
      %65 = vector.broadcast %cst_29 : f32 to vector<1x256xf32>
      %c0_30 = arith.constant 0 : index
      %c0_31 = arith.constant 0 : index
      %c0_32 = arith.constant 0 : index
      %66 = vector.load %arg6[%c0_30, %c0_31, %c0_32] : memref<1x1x256xf32, #tpu.memory_space<vmem>>, vector<1x1x256xf32>
      %67 = vector.shape_cast %66 : vector<1x1x256xf32> to vector<1x256xf32>
      %68 = vector.shape_cast %65 : vector<1x256xf32> to vector<1x1x256xf32>
      tpu.vector_store %arg6[%c0_30, %c0_31, %c0_32], %68 {strides = array<i32>} : memref<1x1x256xf32, #tpu.memory_space<vmem>>, vector<1x1x256xf32>,
    } else {
    }
    %c0 = arith.constant 0 : index
    %c0_1 = arith.constant 0 : index
    %3 = vector.load %arg2[%c0, %c0_1] : memref<25x256xf32, #tpu.memory_space<vmem>>, vector<25x256xf32>
    %c0_2 = arith.constant 0 : index
    %c0_3 = arith.constant 0 : index
    %4 = vector.load %arg3[%c0_2, %c0_3] : memref<1x256xi32, #tpu.memory_space<vmem>>, vector<1x256xi32>
    %c2_i32 = arith.constant 2 : i32
    %5 = arith.muli %arg0, %c2_i32 : i32
    %6 = arith.addi %5, %arg1 : i32
    %c256_i32 = arith.constant 256 : i32
    %7 = arith.muli %6, %c256_i32 : i32
    %8 = tpu.iota {dimensions = array<i32: 1>} : vector<1x256xi32>
    %9 = vector.broadcast %7 : i32 to vector<1x256xi32>
    %10 = arith.addi %9, %8 : vector<1x256xi32>
    %c300_i32 = arith.constant 300 : i32
    %11 = vector.broadcast %c300_i32 : i32 to vector<1x256xi32>
    %12 = arith.cmpi slt, %10, %11 : vector<1x256xi32>
    %c-100_i32 = arith.constant -100 : i32
    %13 = vector.broadcast %c-100_i32 : i32 to vector<1x256xi32>
    %14 = arith.cmpi ne, %4, %13 : vector<1x256xi32>
    %15 = arith.andi %12, %14 : vector<1x256xi1>
    %cst = arith.constant dense<0xFF800000> : vector<256xf32>
    %16 = vector.multi_reduction <maximumf>, %3, %cst [0] : vector<25x256xf32> to vector<256xf32>
    %17 = vector.shape_cast %16 : vector<256xf32> to vector<1x256xf32>
    %18 = vector.broadcast %17 : vector<1x256xf32> to vector<25x256xf32>
    %19 = arith.subf %3, %18 : vector<25x256xf32>
    %20 = math.exp %19 : vector<25x256xf32>
    %cst_4 = arith.constant dense<0.000000e+00> : vector<256xf32>
    %21 = vector.multi_reduction <add>, %20, %cst_4 [0] : vector<25x256xf32> to vector<256xf32>
    %22 = vector.shape_cast %21 : vector<256xf32> to vector<1x256xf32>
    %23 = math.log %22 : vector<1x256xf32>
    %24 = tpu.iota {dimensions = array<i32: 0>} : vector<25x256xi32>
    %25 = vector.broadcast %4 : vector<1x256xi32> to vector<25x256xi32>
    %26 = arith.cmpi eq, %24, %25 : vector<25x256xi32>
    %27 = arith.extui %26 : vector<25x256xi1> to vector<25x256xi32>
    %28 = arith.sitofp %27 : vector<25x256xi32> to vector<25x256xf32>
    %29 = arith.mulf %19, %28 : vector<25x256xf32>
    %cst_5 = arith.constant dense<0.000000e+00> : vector<256xf32>
    %30 = vector.multi_reduction <add>, %29, %cst_5 [0] : vector<25x256xf32> to vector<256xf32>
    %31 = vector.shape_cast %30 : vector<256xf32> to vector<1x256xf32>
    %32 = arith.subf %31, %23 : vector<1x256xf32>
    %c0_6 = arith.constant 0 : index
    %c0_7 = arith.constant 0 : index
    %c0_8 = arith.constant 0 : index
    %33 = vector.load %arg5[%c0_6, %c0_7, %c0_8] : memref<1x1x256xf32, #tpu.memory_space<vmem>>, vector<1x1x256xf32>
    %34 = vector.shape_cast %33 : vector<1x1x256xf32> to vector<1x256xf32>
    %cst_9 = arith.constant 0.000000e+00 : f32
    %35 = vector.broadcast %cst_9 : f32 to vector<1x256xf32>
    %36 = arith.subf %35, %32 : vector<1x256xf32>
    %cst_10 = arith.constant 0.000000e+00 : f32
    %37 = vector.broadcast %cst_10 : f32 to vector<1x256xf32>
    %38 = arith.select %15, %36, %37 : vector<1x256xi1>, vector<1x256xf32>
    %39 = arith.addf %34, %38 : vector<1x256xf32>
    %c0_11 = arith.constant 0 : index
    %c0_12 = arith.constant 0 : index
    %c0_13 = arith.constant 0 : index
    %40 = vector.load %arg5[%c0_11, %c0_12, %c0_13] : memref<1x1x256xf32, #tpu.memory_space<vmem>>, vector<1x1x256xf32>
    %41 = vector.shape_cast %40 : vector<1x1x256xf32> to vector<1x256xf32>
    %42 = vector.shape_cast %39 : vector<1x256xf32> to vector<1x1x256xf32>
    tpu.vector_store %arg5[%c0_11, %c0_12, %c0_13], %42 {strides = array<i32>} : memref<1x1x256xf32, #tpu.memory_space<vmem>>, vector<1x1x256xf32>,
    %c0_14 = arith.constant 0 : index
    %c0_15 = arith.constant 0 : index
    %43 = vector.load %arg4[%c0_14, %c0_15] : memref<25x1xf32, #tpu.memory_space<vmem>>, vector<25x1xf32>
    %44 = vector.broadcast %43 : vector<25x1xf32> to vector<25x256xf32>
    %45 = arith.mulf %44, %28 : vector<25x256xf32>
    %cst_16 = arith.constant dense<0.000000e+00> : vector<256xf32>
    %46 = vector.multi_reduction <add>, %45, %cst_16 [0] : vector<25x256xf32> to vector<256xf32>
    %47 = vector.shape_cast %46 : vector<256xf32> to vector<1x256xf32>
    %48 = math.exp %32 : vector<1x256xf32>
    %49 = arith.mulf %48, %48 : vector<1x256xf32>
    %cst_17 = arith.constant 0.000000e+00 : f32
    %50 = vector.broadcast %cst_17 : f32 to vector<1x256xf32>
    %51 = arith.subf %50, %49 : vector<1x256xf32>
    %c0_18 = arith.constant 0 : index
    %c0_19 = arith.constant 0 : index
    %c0_20 = arith.constant 0 : index
    %52 = vector.load %arg6[%c0_18, %c0_19, %c0_20] : memref<1x1x256xf32, #tpu.memory_space<vmem>>, vector<1x1x256xf32>
    %53 = vector.shape_cast %52 : vector<1x1x256xf32> to vector<1x256xf32>
    %54 = arith.mulf %51, %47 : vector<1x256xf32>
    %cst_21 = arith.constant 0.000000e+00 : f32
    %55 = vector.broadcast %cst_21 : f32 to vector<1x256xf32>
    %56 = arith.select %15, %54, %55 : vector<1x256xi1>, vector<1x256xf32>
    %57 = arith.addf %53, %56 : vector<1x256xf32>
    %c0_22 = arith.constant 0 : index
    %c0_23 = arith.constant 0 : index
    %c0_24 = arith.constant 0 : index
    %58 = vector.load %arg6[%c0_22, %c0_23, %c0_24] : memref<1x1x256xf32, #tpu.memory_space<vmem>>, vector<1x1x256xf32>
    %59 = vector.shape_cast %58 : vector<1x1x256xf32> to vector<1x256xf32>
    %60 = vector.shape_cast %57 : vector<1x256xf32> to vector<1x1x256xf32>
    tpu.vector_store %arg6[%c0_22, %c0_23, %c0_24], %60 {strides = array<i32>} : memref<1x1x256xf32, #tpu.memory_space<vmem>>, vector<1x1x256xf32>,
    return
  }
  func.func @transform_0(%arg0: i32, %arg1: i32) -> (i32, i32) {
    %c2_i32 = arith.constant 2 : i32
    %0 = arith.muli %arg0, %c2_i32 : i32
    %1 = arith.addi %0, %arg1 : i32
    %c1_i32 = arith.constant 1 : i32
    %2 = arith.minsi %1, %c1_i32 : i32
    %c0_i32 = arith.constant 0 : i32
    %c0_i32_0 = arith.constant 0 : i32
    return %c0_i32, %2 : i32, i32
  }
  func.func @transform_1(%arg0: i32, %arg1: i32) -> (i32, i32) {
    %c2_i32 = arith.constant 2 : i32
    %0 = arith.muli %arg0, %c2_i32 : i32
    %1 = arith.addi %0, %arg1 : i32
    %c1_i32 = arith.constant 1 : i32
    %2 = arith.minsi %1, %c1_i32 : i32
    %c0_i32 = arith.constant 0 : i32
    %c0_i32_0 = arith.constant 0 : i32
    return %c0_i32, %2 : i32, i32
  }
  func.func @transform_2(%arg0: i32, %arg1: i32) -> (i32, i32) {
    %c0_i32 = arith.constant 0 : i32
    %c0_i32_0 = arith.constant 0 : i32
    %c0_i32_1 = arith.constant 0 : i32
    return %c0_i32, %c0_i32_0 : i32, i32
  }
  func.func @transform_3(%arg0: i32, %arg1: i32) -> (i32, i32, i32) {
    %c0_i32 = arith.constant 0 : i32
    %c0_i32_0 = arith.constant 0 : i32
    %c0_i32_1 = arith.constant 0 : i32
    return %arg0, %c0_i32, %c0_i32_0 : i32, i32, i32
  }
  func.func @transform_4(%arg0: i32, %arg1: i32) -> (i32, i32, i32) {
    %c0_i32 = arith.constant 0 : i32
    %c0_i32_0 = arith.constant 0 : i32
    %c0_i32_1 = arith.constant 0 : i32
    return %arg0, %c0_i32, %c0_i32_0 : i32, i32, i32
  }
}

</mosaic_0001>

<bundles_post_ra>
// kernel: tpu_custom_call.1
= control target key start
LH: loop header
LB: loop body
LE: loop exit
PB: predicated region body
PF: predicated region fallthrough
CT: control target
= control target key end

     0   :  { %10 = vsyncpa [#allocation3], 0  ;;  %s1284_s0 = inlined_call_operand.hbm [shape: f32[25,300], index: 0, kind: input, shape index: {}]   ;;  %s1285_s1 = inlined_call_operand.vmem [shape: s32[1,300], index: 1, kind: input, shape index: {}]   ;;  %s1286_s2 = inlined_call_operand.vmem [shape: f32[25,1], index: 2, kind: input, shape index: {}]   ;;  %s1287_s3 = inlined_call_operand.hbm [shape: f32[1,1,256], index: 3, kind: output, shape index: {0}]   ;;  %s1288_s4 = inlined_call_operand.hbm [shape: f32[1,1,256], index: 4, kind: output, shape index: {1}]  }
   0x1   :  { %12 = vsyncpa [#allocation3 + $0x1], 0 }
   0x2   :  { %13 = vsyncpa [#allocation4], 0 }
   0x3   :  { %14 = vsyncpa [#allocation7], 0  ;;  %s1017_s15 = smov 0   ;;  %s1019_s16 = smov 0  }
   0x4   :  { %s1021_s17 = smov 0   ;;  %s1023_s18 = smov 0  }
   0x5   :  { %s1025_s19 = smov 0   ;;  %s1027_s20 = smov 0  }
   0x6 LB: > { %s29_s21 = sadd.s32 1, %s977_s19  ;;  %p38_p1 = scmp.lt.s32.totalorder %s977_s19, 1  ;;  %s981_s20 = sphi %s1027_s20, %s20_s20   ;;  %s977_s19 = sphi %s1025_s19, %s1301_s19   ;;  %s973_s18 = sphi %s1023_s18, %s1300_s18   ;;  %s969_s17 = sphi %s1021_s17, %s1299_s17   ;;  %s965_s16 = sphi %s1019_s16, %s1298_s16   ;;  %s961_s15 = sphi %s1017_s15, %s1297_s15  }
   0x7   : > { %p30_p0 = scmp.ge.s32.totalorder %s29_s21, 2  ;;  %s721_s22 = sadd.s32 4294967295, %s981_s20  }
   0x8   : > { %p54_p2 = scmp.ne.s32.totalorder %s969_s17, %s965_s16  ;;  %p55_p4 = scmp.eq.s32.totalorder %s981_s20, 0 }
   0x9   : > { %s1303_s21 = smov (%p30_p0, %s29_s21), 0  ;;  %p60_p5 = scmp.ne.s32.totalorder %s965_s16, %s961_s15 }
   0xa   : > { %s1053_s23 = scalar_select %p38_p1, %s977_s19, 1 }
   0xb   : > { %p42_p3 = scmp.lt.s32.totalorder %s1303_s21, 1  ;;  %p61_p6 = scmp.eq.s32.totalorder %s721_s22, 0 }
   0xc   : > { %p56_p7 = por %p55_p4, %p54_p2  ;;  %s47_s27 = sadd.s32 1, %s969_s17 }
   0xd   : > { %s43_s24 = scalar_select %p42_p3, %s1303_s21, 1 }
   0xe   : > { %p1061_p8 = por %p61_p6, %p60_p5  ;;  %p723_p10 = scmp.ge.s32.totalorder %s981_s20, 2 }
   0xf   : > { %s44_s26 = ssub.s32 %s1053_s23, %s43_s24 }
  0x10   : > { %p45_p9 = scmp.eq.s32.totalorder %s44_s26, 0  ;;  %190 = sbr.rel (%p723_p10) target bundleno = 44 (0x2c), region = 20 }
  0x12   : > { %s1068_s28 = scalar_select %p45_p9, %s969_s17, %s47_s27  }
  0x15   : > { %193 = sbr.rel (!%p56_p7) target bundleno = 44 (0x2c), region = 24  ;;  %s194_s29 = sand.u32 (%p56_p7), 1, %s969_s17  }
  0x16   : > { %s725_s30 = sshll.u32 (%p56_p7), %s1053_s23, 1  ;;  %s724_s5 = sshll.u32 (%p56_p7), %s194_s29, 6 }
  0x17   : > { %s204_s6 = ssub.s32 (%p56_p7), 3, %s725_s30  ;;  %s1079_s9 = scalar_lea.sflag (%p56_p7), [#allocation3], %s194_s29 }
  0x18   : > { %p205_p11 = scmp.lt.s32.totalorder (%p56_p7), %s204_s6, 2  ;;  %s198_s10 = scalar_lea.vmem (%p56_p7), [#allocation2], %s724_s5 }
  0x1a   : > { %s1305_s6 = smov (!%p205_p11, %s204_s6), 2 }
  0x1b   : > { %s1076_s7 = sshll.u32 %s1305_s6, 9 }
  0x1c   : > { %s209_s8 = ssub.s32 1024, %s1076_s7 }
  0x1d   : > { %210 = vsyncadd %s1079_s9, %s209_s8  ;;  %p727_p12 = scmp.ne.s32.totalorder %s1076_s7, 0  ;;  %s751_s11 = sshll.u32 %s1053_s23, 8 }
  0x1e   : > { %s213_s14 = scalar_lea.hbm %s1284_s0, %s751_s11  ;;  %s729_s15 = sshll.u32 %s1305_s6, 3 }
  0x1f   : > { %s216_s24 = sshll.u32 %s198_s10, 4  ;;  %s983_s27 = smov [#allocation2]   ;;  %s217_s24 = int_to_ptr.vmem [resolvable:$true] %s216_s24 }
  0x20   : > { %s861_s26 = scalar_lea.vmem %s217_s24, %s1076_s7  ;;  %s865_s29 = sshll.u32 %s983_s27, 4  ;;  %s866_s29 = int_to_ptr.vmem [resolvable:$false] %s865_s29 }
  0x21   : > { %p862_p13 = scmp.ne.s32.totalorder %s217_s24, %s861_s26  ;;  %s867_s30 = scalar_lea.vmem %s866_s29, 2048 }
  0x22   : > { %p868_p2 = scmp.lt.s32.totalorder %s217_s24, %s866_s29  ;;  %p869_p3 = scmp.lt.s32.totalorder %s867_s30, %s861_s26 }
  0x23   : > { %p863_p0 = pnand %p862_p13, %p727_p12 }
  0x24   : > { %p870_p4 = por %p869_p3, %p868_p2 }
  0x25   : > { %p864_p1 = pneg %p863_p0 }
  0x27   : > { %p871_p5 = pnand %p870_p4, %p864_p1 }
  0x29   : > { %874 = shalt.err (!%p871_p5)
}
  0x2a   : > { %s984_s23 = smov 384   ;;  %s985_s5 = smov 256  }
  0x2b   : > { %222 = dma.hbm_to_vmem [thread:$0]  (%p727_p12), %s213_s14, %s1076_s7, %s217_s24, %s1079_s9, %s984_s23, %s985_s5, %s729_s15  }
  0x2c PF: > { %p732_p6 = scmp.ge.s32.totalorder %s981_s20, 1  ;;  %p248_p7 = scmp.lt.s32.totalorder %s981_s20, 3 }
  0x2e   : > { %p249_p9 = pnand %p732_p6, %p248_p7 }
  0x2f   : > { %s254_s6 = sand.u32 (!%p249_p9), 1, %s965_s16  }
  0x30   : > { %252 = sbr.rel (%p249_p9) target bundleno = 235 (0xeb), region = 32  ;;  %s733_s8 = sshll.u32 (!%p249_p9), %s254_s6, 6 }
  0x31   : > { %s255_s10 = scalar_lea.sflag (!%p249_p9), [#allocation3], %s254_s6  ;;  %s1098_s11 = scalar_lea.vmem (!%p249_p9), [#allocation2], %s733_s8 }
  0x35   : > { %948 = dma.done.wait (%p1061_p8), %s255_s10, 1024  }
  0x36   : > { %950 = vsyncadd (%p1061_p8), %s255_s10, 4294966272  ;;  %p301_p10 = scmp.lt.s32.totalorder %s973_s18, 1  ;;  %p735_p12 = scmp.ne.s32.totalorder %s973_s18, 0 }
  0x38   : > { %s302_s7 = scalar_select %p301_p10, %s973_s18, 1 }
  0x3a   : > { %s734_s9 = sshll.u32 %s302_s7, 1  ;;  %323 = sbr.rel (%p735_p12) target bundleno = 67 (0x43), region = 40 }
  0x3b   : > { %p308_p11 = scmp.lt.s32.totalorder %s734_s9, 2 }
  0x3d   : > { %s1307_s9 = smov (!%p308_p11, %s734_s9), 2 }
  0x3e   : > { %s310_s14 = scalar_lea.vmem %s1285_s1, %s1307_s9 }
  0x3f   : > { %v324_v0 = vlaneseq  ;;  %v986_v1 = vmov 0.0  }
  0x41   : > { %vm326_vm0 = vcmp.lt.s32.totalorder %v324_v0, 256 }
  0x42   : > { %328 = vst.msk [vmem:[#allocation5] sm:$0x3] %vm326_vm0, %v986_v1  ;;  %329 = vst.msk [vmem:[#allocation6] sm:$0x3] %vm326_vm0, %v986_v1 }
  0x43 PF: > { %v531_v2 = vld [vmem:[%s1286_s2 + $0x10] sm:$0xff]  ;;  %v529_v3 = vld [vmem:[%s1286_s2] sm:$0xff]  ;;  %v987_v4 = vmov 0   ;;  %v532_v5 = vld [vmem:[%s1286_s2 + $0x18] sm:$0x1]  ;;  %vm365_vm1 = vcmask 1040384   ;;  %v342_v31 = vlaneseq }
  0x44   : > { %824 = vset.pattern.permute.xlu1 %v987_v4  ;;  %823 = vset.pattern.permute.xlu0 %v987_v4  ;;  %v530_v6 = vld [vmem:[%s1286_s2 + $0x8] sm:$0xff]  ;;  %v330_v7 = vld [vmem:[%s1098_s11] sm:$0xff]  ;;  %v332_v11 = vld [vmem:[%s1098_s11 + $0x10] sm:$0xff]  ;;  %v988_v61 = vmov 0.0   ;;  %s736_s8 = sshll.u32 %s973_s18, 8  ;;  %s990_s18 = smov [#allocation5]  }
  0x45   : > { %545 = vperm.xlu1 %824, %v531_v2   ;;  %535 = vperm.xlu0 %823, %v529_v3   ;;  %v331_v8 = vld [vmem:[%s1098_s11 + $0x8] sm:$0xff]  ;;  %v334_v9 = vld [vmem:[%s1098_s11 + $0x20] sm:$0xff]  ;;  %v336_v12 = vld [vmem:[%s1098_s11 + $0x30] sm:$0x1]  ;;  %v1138_v36 = vshrl.u32 %v342_v31, 7  ;;  %s624_s10 = sshll.u32 %s990_s18, 4  ;;  %s625_s10 = int_to_ptr.vmem [resolvable:$true] %s624_s10 }
  0x46   : > { %v335_v10 = vld [vmem:[%s1098_s11 + $0x28] sm:$0xff]  ;;  %v333_v13 = vld [vmem:[%s1098_s11 + $0x18] sm:$0xff]  ;;  %v364_v15 = vmax.f32 %v330_v7, %v334_v9  ;;  %v366_v16 = vsel %vm365_vm1, %v336_v12, -inf  ;;  %v1146_v51 = vld [vmem:[%s310_s14] sm:$0x3]  ;;  %p1220_p8 = scmp.eq.s32.totalorder %s721_s22, 1  ;;  %p882_p2 = scmp.lt.s32.totalorder %s625_s10, %s625_s10 }
  0x47   : > { %v337_v14 = vld [vmem:[%s1098_s11 + $0x38] sm:$0x1]  ;;  %v375_v17 = vmax.f32 %v331_v8, %v335_v10  ;;  %v367_v18 = vmax.f32 %v332_v11, %v366_v16  ;;  %v354_v49 = vsub.s32 0, %v1138_v36  ;;  %v358_v52 = vsub.s32 1, %v1138_v36  ;;  %s875_s7 = scalar_lea.vmem %s625_s10, 32 }
  0x48   : > { %v376_v19 = vsel %vm365_vm1, %v337_v14, -inf  ;;  %v435_v57 = vadd.s32 8, %v1138_v36  ;;  %v436_v59 = vadd.s32 16, %v1138_v36  ;;  %v437_v60 = vadd.s32 24, %v1138_v36  ;;  %p876_p13 = scmp.ne.s32.totalorder %s625_s10, %s875_s7  ;;  %p883_p3 = scmp.lt.s32.totalorder %s875_s7, %s875_s7 }
  0x49   : > { %550 = vperm.xlu1 %824, %v532_v5   ;;  %540 = vperm.xlu0 %823, %v530_v6   ;;  %v377_v20 = vmax.f32 %v333_v13, %v376_v19  ;;  %v368_v21 = vmax.f32 %v364_v15, %v367_v18  ;;  %v441_v56 = vrot.slane %v1146_v51, %v354_v49  ;;  %vm350_vm10 = vcmp.ne.s32.totalorder %v1146_v51, 4294967196 }
  0x4a   : > { %v445_v58 = vrot.slane %v1146_v51, %v358_v52  ;;  %p877_p0 = pnand %p876_p13, %p1220_p8  ;;  %p884_p4 = por %p883_p3, %p882_p2 }
  0x4b   : > { %v378_v22 = vmax.f32 %v375_v17, %v377_v20  ;;  %v369_v23 = vrot.slane %v368_v21, 4  ;;  %vm446_vm2 = vcmp.eq.s32.totalorder %v1138_v36, %v441_v56  ;;  %vm448_vm3 = vcmp.eq.s32.totalorder %v435_v57, %v441_v56 }
  0x4c   : > { %vm447_vm4 = vcmp.eq.s32.totalorder %v1138_v36, %v445_v58  ;;  %vm449_vm5 = vcmp.eq.s32.totalorder %v435_v57, %v445_v58  ;;  %v1160_v62 = vsel %vm446_vm2, 1.0, %v988_v61  ;;  %v1162_v63 = vsel %vm448_vm3, 1.0, %v988_v61  ;;  %p878_p1 = pneg %p877_p0 }
  0x4d   : > { %v379_v24 = vrot.slane %v378_v22, 4  ;;  %v370_v25 = vmax.f32 %v368_v21, %v369_v23  ;;  %vm450_vm6 = vcmp.eq.s32.totalorder %v436_v59, %v441_v56  ;;  %v1164_v0 = vsel %vm447_vm4, 1.0, %v988_v61 }
  0x4e   : > { %v1166_v1 = vsel %vm449_vm5, 1.0, %v988_v61  ;;  %vm451_vm7 = vcmp.eq.s32.totalorder %v436_v59, %v445_v58  ;;  %vm452_vm8 = vcmp.eq.s32.totalorder %v437_v60, %v441_v56  ;;  %vm453_vm9 = vcmp.eq.s32.totalorder %v437_v60, %v445_v58  ;;  %p885_p5 = pnand %p884_p4, %p878_p1 }
  0x4f   : > { %v380_v26 = vmax.f32 %v378_v22, %v379_v24  ;;  %v371_v27 = vrot.slane %v370_v25, 2  ;;  %v1178_v15 = vsel %vm453_vm9, 1.0, %v988_v61  ;;  %vm1214_vm2 = vcmp.lt.s32.totalorder %v342_v31, 256 }
  0x51   : > { %v381_v28 = vrot.slane %v380_v26, 2  ;;  %v372_v29 = vmax.f32 %v370_v25, %v371_v27 }
  0x53   : > { %v382_v30 = vmax.f32 %v380_v26, %v381_v28  ;;  %v373_v32 = vrot.slane %v372_v29, 1 }
  0x55   : > { %v383_v33 = vrot.slane %v382_v30, 1  ;;  %v374_v34 = vmax.f32 %v372_v29, %v373_v32 }
  0x57   : > { %v384_v35 = vmax.f32 %v382_v30, %v383_v33  ;;  %v389_v37 = vsub.f32 %v334_v9, %v374_v34  ;;  %v385_v38 = vsub.f32 %v330_v7, %v374_v34  ;;  %v391_v39 = vsub.f32 %v336_v12, %v374_v34 }
  0x58   : > { %v387_v45 = vsub.f32 %v332_v11, %v374_v34  ;;  %v1174_v12 = vsel %vm451_vm7, 1.0, %v988_v61 }
  0x59   : > { %v390_v40 = vsub.f32 %v335_v10, %v384_v35  ;;  %v386_v41 = vsub.f32 %v331_v8, %v384_v35  ;;  %v392_v42 = vsub.f32 %v337_v14, %v384_v35  ;;  %v401_v43 = vmul.f32 1.442695, %v389_v37 }
  0x5a   : > { %v393_v44 = vmul.f32 1.442695, %v385_v38  ;;  %v388_v48 = vsub.f32 %v333_v13, %v384_v35  ;;  %v405_v50 = vmul.f32 1.442695, %v391_v39  ;;  %v397_v54 = vmul.f32 1.442695, %v387_v45 }
  0x5b   : > { %v403_v46 = vmul.f32 1.442695, %v390_v40  ;;  %v395_v47 = vmul.f32 1.442695, %v386_v41  ;;  %825 = vpow2.f32 %v401_v43  ;;  %v407_v53 = vmul.f32 1.442695, %v392_v42 }
  0x5c   : > { %v399_v55 = vmul.f32 1.442695, %v388_v48  ;;  %v470_v5 = vmul.f32 %v1160_v62, %v385_v38  ;;  %v472_v6 = vmul.f32 %v1162_v63, %v387_v45  ;;  %v1170_v8 = vsel %vm450_vm6, 1.0, %v988_v61 }
  0x5d   : > { %827 = vpow2.f32 %v403_v46  ;;  %v471_v9 = vmul.f32 %v1164_v0, %v386_v41  ;;  %v473_v10 = vmul.f32 %v1166_v1, %v388_v48  ;;  %v1176_v13 = vsel %vm452_vm8, 1.0, %v988_v61 }
  0x5e   : > { %829 = vpow2.f32 %v393_v44  ;;  %v474_v17 = vmul.f32 %v1170_v8, %v389_v37  ;;  %v478_v18 = vadd.f32 %v472_v6, %v470_v5  ;;  %v475_v20 = vmul.f32 %v1174_v12, %v390_v40 }
  0x5f   : > { %831 = vpow2.f32 %v395_v47  ;;  %v476_v21 = vmul.f32 %v1176_v13, %v391_v39  ;;  %v488_v22 = vadd.f32 %v473_v10, %v471_v9  ;;  %v477_v24 = vmul.f32 %v1178_v15, %v392_v42 }
  0x60   : > { %833 = vpow2.f32 %v405_v50  ;;  %v479_v30 = vadd.f32 %v478_v18, %v474_v17  ;;  %v351_v9 = vsel %vm350_vm10, 1, %v987_v4 }
  0x61   : > { %835 = vpow2.f32 %v407_v53  ;;  %v480_v32 = vsel %vm365_vm1, %v476_v21, 0.0  ;;  %v489_v34 = vadd.f32 %v488_v22, %v475_v20  ;;  %v490_v35 = vsel %vm365_vm1, %v477_v24, 0.0 }
  0x62   : > { %837 = vpow2.f32 %v397_v54  ;;  %v481_v40 = vadd.f32 %v480_v32, %v479_v30  ;;  %v359_v18 = vrot.slane %v351_v9, %v358_v52  ;;  %v989_v20 = vmov 1966171168  }
  0x63   : > { %839 = vpow2.f32 %v399_v55  ;;  %v491_v42 = vadd.f32 %v490_v35, %v489_v34  ;;  %v509_v21 = vunpack.c.l.s4 %v989_v20 }
  0x64   : > { %v482_v45 = vrot.slane %v481_v40, 4  ;;  %vm361_vm14 = vcmp.ne.s32.totalorder %v359_v18, 0 }
  0x65   : > { %v492_v47 = vrot.slane %v491_v42, 4 }
  0x66   : > { %v483_v54 = vadd.f32 %v482_v45, %v481_v40 }
  0x67   : > { %v493_v56 = vadd.f32 %v492_v47, %v491_v42 }
  0x68   : > { %v826_v2 = vpop.eup %825  ;;  %v484_v60 = vrot.slane %v483_v54, 2 }
  0x69   : > { %v494_v61 = vrot.slane %v493_v56, 2 }
  0x6a   : > { %v828_v3 = vpop.eup %827 }
  0x6b   : > { %v830_v7 = vpop.eup %829  ;;  %v495_v5 = vadd.f32 %v494_v61, %v493_v56 }
  0x6c   : > { %v832_v11 = vpop.eup %831 }
  0x6d   : > { %v834_v14 = vpop.eup %833 }
  0x6e   : > { %v836_v16 = vpop.eup %835  ;;  %v411_v26 = vsel %vm365_vm1, %v834_v14, 0.0 }
  0x6f   : > { %v838_v19 = vpop.eup %837  ;;  %v421_v28 = vsel %vm365_vm1, %v836_v16, 0.0  ;;  %v355_v16 = vrot.slane %v351_v9, %v354_v49 }
  0x70   : > { %v840_v23 = vpop.eup %839  ;;  %v409_v25 = vadd.f32 %v838_v19, %v830_v7  ;;  %v345_v7 = vstv %s736_s8 }
  0x71   : > { %v419_v27 = vadd.f32 %v840_v23, %v832_v11  ;;  %v496_v11 = vrot.slane %v495_v5, 1  ;;  %vm360_vm12 = vcmp.ne.s32.totalorder %v355_v16, 0 }
  0x72   : > { %v410_v29 = vadd.f32 %v826_v2, %v409_v25  ;;  %v343_v2 = vand.u32 127, %v342_v31 }
  0x73   : > { %v420_v33 = vadd.f32 %v828_v3, %v419_v27  ;;  %v485_v3 = vadd.f32 %v484_v60, %v483_v54  ;;  %v497_v22 = vadd.f32 %v496_v11, %v495_v5 }
  0x74   : > { %v412_v37 = vadd.f32 %v411_v26, %v410_v29  ;;  %v344_v6 = vadd.s32 128, %v343_v2  ;;  %v346_v14 = vadd.s32 %v345_v7, %v343_v2  ;;  %v510_v26 = vunpack.c.0.s8 %v509_v21 }
  0x75   : > { %v422_v38 = vadd.f32 %v421_v28, %v420_v33  ;;  %v486_v10 = vrot.slane %v485_v3, 1 }
  0x76   : > { %v413_v39 = vrot.slane %v412_v37, 4  ;;  %v347_v17 = vadd.s32 %v345_v7, %v344_v6  ;;  %vm348_vm11 = vcmp.lt.s32.totalorder %v346_v14, 300  ;;  %v1207_v32 = vsub.s32 %v510_v26, %v1138_v36 }
  0x77   : > { %v423_v41 = vrot.slane %v422_v38, 4  ;;  %v487_v19 = vadd.f32 %v486_v10, %v485_v3  ;;  %vm1196_vm15 = vmand %vm348_vm11, %vm360_vm12 }
  0x78   : > { %v414_v43 = vadd.f32 %v413_v39, %v412_v37  ;;  %vm349_vm13 = vcmp.lt.s32.totalorder %v347_v17, 300  ;;  %v500_v37 = vld [vmem:[#allocation5] sm:$0x3] }
  0x79   : > { %v424_v44 = vadd.f32 %v423_v41, %v422_v38  ;;  %vm1200_vm0 = vmand %vm349_vm13, %vm361_vm14 }
  0x7a   : > { %v415_v46 = vrot.slane %v414_v43, 2 }
  0x7b   : > { %v425_v48 = vrot.slane %v424_v44, 2 }
  0x7c   : > { %v416_v50 = vadd.f32 %v415_v46, %v414_v43 }
  0x7d   : > { %v426_v53 = vadd.f32 %v425_v48, %v424_v44 }
  0x7e   : > { %v417_v55 = vrot.slane %v416_v50, 1 }
  0x7f   : > { %v427_v57 = vrot.slane %v426_v53, 1 }
  0x80   : > { %v418_v58 = vadd.f32 %v417_v55, %v416_v50 }
  0x81   : > { %v428_v59 = vadd.f32 %v427_v57, %v426_v53 }
  0x82   : > { %841 = vlog2.f32 %v418_v58 }
  0x83   : > { %843 = vlog2.f32 %v428_v59 }
  0x8f   : > { %v842_v51 = vpop.eup %841 }
  0x90   : > { %v844_v23 = vpop.eup %843  ;;  %v430_v24 = vmul.f32 0.6931472, %v842_v51 }
  0x91   : > { %v432_v4 = vmul.f32 0.6931472, %v844_v23 }
  0x92   : > { %v498_v25 = vsub.f32 %v487_v19, %v430_v24 }
  0x93   : > { %v499_v52 = vsub.f32 %v497_v22, %v432_v4 }
  0x94   : > { %v501_v28 = vsub.f32 0.0, %v498_v25 }
  0x95   : > { %v502_v29 = vsub.f32 0.0, %v499_v52 }
  0x96   : > { %v503_v30 = vsel %vm1196_vm15, %v501_v28, 0.0 }
  0x97   : > { %v504_v33 = vsel %vm1200_vm0, %v502_v29, 0.0 }
  0x98   : > { %v507_v34 = vcombine.low %v503_v30, %v504_v33 }
  0x9a   : > { %v514_v35 = vrot.slane %v507_v34, %v1207_v32 }
  0x9c   : > { %v521_v38 = vrot.slane %v514_v35, %v1207_v32 }
  0x9e   : > { %v523_v36 = vadd.f32 %v521_v38, %v500_v37 }
  0xa0   : > { %528 = vst.msk [vmem:[#allocation5] sm:$0x3] %vm1214_vm2, %v523_v36 }
  0xa1   : > { %888 = shalt.err (!%p885_p5)
}
  0xa2   : > { %756 = dma.vmem_to_hbm [thread:$0]  (%p1220_p8), %s625_s10, 32, %s1287_s3, [#allocation4]   ;;  %v581_v31 = vmul.f32 1.442695, %v498_v25  ;;  %v583_v40 = vmul.f32 1.442695, %v499_v52 }
  0xa3   : > { %v589_v24 = vld [vmem:[#allocation6] sm:$0x3]  ;;  %s991_s12 = smov [#allocation6]  }
  0xa4   : > { %845 = vpow2.f32 %v581_v31  ;;  %s638_s13 = sshll.u32 %s991_s12, 4  ;;  %s639_s13 = int_to_ptr.vmem [resolvable:$true] %s638_s13 }
  0xa5   : > { %847 = vpow2.f32 %v583_v40  ;;  %s899_s14 = scalar_lea.vmem %s639_s13, 32  ;;  %p906_p10 = scmp.lt.s32.totalorder %s639_s13, %s639_s13 }
  0xa6   : > { %p900_p6 = scmp.ne.s32.totalorder %s639_s13, %s899_s14  ;;  %p907_p11 = scmp.lt.s32.totalorder %s899_s14, %s899_s14 }
  0xa8   : > { %p901_p7 = pnand %p900_p6, %p1220_p8  ;;  %p908_p12 = por %p907_p11, %p906_p10 }
  0xaa   : > { %p902_p9 = pneg %p901_p7 }
  0xac   : > { %p909_p13 = pnand %p908_p12, %p902_p9 }
  0xb1   : > { %v846_v61 = vpop.eup %845 }
  0xb2   : > { %v585_v6 = vmul.f32 %v846_v61, %v846_v61 }
  0xb4   : > { %v587_v14 = vsub.f32 0.0, %v585_v6 }
  0xc0   : > { %v546_v41 = vpop.permute.xlu1 %545  ;;  %v536_v42 = vpop.permute.xlu0 %535 }
  0xc1   : > { %v553_v45 = vmul.f32 %v1160_v62, %v536_v42  ;;  %v554_v46 = vmul.f32 %v1164_v0, %v536_v42  ;;  %v557_v54 = vmul.f32 %v1170_v8, %v546_v41  ;;  %v558_v55 = vmul.f32 %v1174_v12, %v546_v41 }
  0xc4   : > { %v551_v43 = vpop.permute.xlu1 %550  ;;  %v541_v44 = vpop.permute.xlu0 %540 }
  0xc5   : > { %v555_v47 = vmul.f32 %v1162_v63, %v541_v44  ;;  %v556_v48 = vmul.f32 %v1166_v1, %v541_v44  ;;  %v559_v50 = vmul.f32 %v1176_v13, %v551_v43  ;;  %v560_v53 = vmul.f32 %v1178_v15, %v551_v43  ;;  %v848_v13 = vpop.eup %847 }
  0xc6   : > { %v586_v12 = vmul.f32 %v848_v13, %v848_v13 }
  0xc7   : > { %v561_v56 = vadd.f32 %v555_v47, %v553_v45  ;;  %v571_v57 = vadd.f32 %v556_v48, %v554_v46  ;;  %v563_v62 = vsel %vm365_vm1, %v559_v50, 0.0  ;;  %v573_v0 = vsel %vm365_vm1, %v560_v53, 0.0 }
  0xc8   : > { %v588_v16 = vsub.f32 0.0, %v586_v12 }
  0xc9   : > { %v562_v58 = vadd.f32 %v561_v56, %v557_v54  ;;  %v572_v59 = vadd.f32 %v571_v57, %v558_v55 }
  0xcb   : > { %v564_v60 = vadd.f32 %v563_v62, %v562_v58  ;;  %v574_v63 = vadd.f32 %v573_v0, %v572_v59 }
  0xcd   : > { %v565_v1 = vrot.slane %v564_v60, 4  ;;  %v575_v2 = vrot.slane %v574_v63, 4 }
  0xcf   : > { %v566_v3 = vadd.f32 %v565_v1, %v564_v60  ;;  %v576_v15 = vadd.f32 %v575_v2, %v574_v63 }
  0xd1   : > { %v567_v5 = vrot.slane %v566_v3, 2  ;;  %v577_v8 = vrot.slane %v576_v15, 2 }
  0xd3   : > { %v568_v7 = vadd.f32 %v567_v5, %v566_v3  ;;  %v578_v9 = vadd.f32 %v577_v8, %v576_v15 }
  0xd5   : > { %v569_v10 = vrot.slane %v568_v7, 1  ;;  %v579_v11 = vrot.slane %v578_v9, 1 }
  0xd7   : > { %v570_v17 = vadd.f32 %v569_v10, %v568_v7  ;;  %v580_v18 = vadd.f32 %v579_v11, %v578_v9 }
  0xd9   : > { %v590_v19 = vmul.f32 %v587_v14, %v570_v17  ;;  %v591_v20 = vmul.f32 %v588_v16, %v580_v18 }
  0xdb   : > { %v592_v21 = vsel %vm1196_vm15, %v590_v19, 0.0  ;;  %v593_v51 = vsel %vm1200_vm0, %v591_v20, 0.0 }
  0xdc   : > { %v596_v22 = vcombine.low %v592_v21, %v593_v51 }
  0xde   : > { %v603_v23 = vrot.slane %v596_v22, %v1207_v32 }
  0xe0   : > { %v610_v4 = vrot.slane %v603_v23, %v1207_v32 }
  0xe2   : > { %v612_v25 = vadd.f32 %v610_v4, %v589_v24 }
  0xe4   : > { %613 = vst.msk [vmem:[#allocation6] sm:$0x3] %vm1214_vm2, %v612_v25 }
  0xe5   : > { %912 = shalt.err (!%p909_p13)
}
  0xe6   : > { %758 = dma.vmem_to_hbm [thread:$0]  (%p1220_p8), %s639_s13, 32, %s1288_s4, [#allocation7]  }
  0xe7   : > { %952 = dma.done.wait (%p1220_p8), [#allocation4], 32  }
  0xe8   : > { %954 = vsyncadd (%p1220_p8), [#allocation4], 4294967264 }
  0xe9   : > { %956 = dma.done.wait (%p1220_p8), [#allocation7], 32  }
  0xea   : > { %958 = vsyncadd (%p1220_p8), [#allocation7], 4294967264 }
  0xeb PF: > { %s20_s20 = sadd.s32 1, %s981_s20   ;;  %s1297_s15 = smov %s965_s16 }
  0xec   : > { %p17_p0 = scmp.ge.s32.totalorder %s20_s20, 4   ;;  %s1298_s16 = smov %s969_s17 }
  0xed   : > { %s1299_s17 = smov %s1068_s28  ;;  %s1300_s18 = smov %s977_s19 }
  0xee   : > { %s1301_s19 = smov %s1303_s21  ;;  %19 = sbr.rel (!%p17_p0) target bundleno = 6 (0x6), region = 86 }
  0xf3   :  { %655 = vsyncpa [#allocation3], 1 }
  0xf4   :  { %657 = vsyncpa [#allocation3 + $0x1], 1 }
  0xf5   :  { %658 = vsyncpa [#allocation4], 1 }
  0xf6   :  { %660 = vsyncpa [#allocation4 + $0x1], 1 }
  0xf7   :  { %661 = vsyncpa [#allocation7], 1 }

</bundles_post_ra>
